<compile_context>
chip_gen: v5e
topology: v5e:2x2
jax: 0.10.0
libtpu: 0.0.40
codegen_flags: <defaults>
</compile_context>

<pallas_src>
import math

import jax
import jax.numpy as jnp
from jax.experimental import pallas as pl
from jax.experimental.pallas import tpu as pltpu


# Per-block byte budget: ~2 MiB => <= ~8 MiB live with double-buffered in + out,
# safely under the scoped-VMEM defaults on v5e (16 MiB), v6e (32 MiB), v7x (32 MiB).
_BLOCK_BYTE_BUDGET = 2 * 1024 * 1024
# Keep blocks at least this big so the ~0.35us per-grid-step overhead is hidden.
_MIN_BLOCK_BYTES = 256 * 1024
# Target at least this many grid steps on the small path (pipeline overlap +
# megacore sharding on v7x) when there is enough data to split.
_SMALL_PATH_STEPS = 4
# Large-trailing-dim tiles. tm maps to the OUTPUT's last (lane) dim -> keep it
# the wide one; both are multiples of 128 (lanes) and of 8/16/32 sublanes.
_TILE_M = 1024
_TILE_N = 512


def _transpose_batched_kernel(x_ref, o_ref):
    # x_ref: (bc_tile, M, N) ; o_ref: (bc_tile, N, M) — minor-dim transpose (XLU).
    o_ref[...] = jnp.swapaxes(x_ref[...], -1, -2)


def _transpose_tiled_kernel(x_ref, o_ref):
    # Leading BC block dim is pl.Squeezed(); x_ref: (tm, tn), o_ref: (tn, tm).
    o_ref[...] = x_ref[...].T


def _cost(nbytes):
    # Bandwidth-only custom call: read everything once, write everything once.
    return pl.CostEstimate(flops=0, transcendentals=0, bytes_accessed=2 * nbytes)


def _transpose_small_trailing(x3):
    """x3: (BC, M, N) with a small M*N slab -> batch BC slices per grid step."""
    BC, M, N = x3.shape
    slab_bytes = M * N * x3.dtype.itemsize

    # Budget-derived block height along BC.
    bc_tile = min(BC, max(1, _BLOCK_BYTE_BUDGET // slab_bytes))
    # Prefer >=_SMALL_PATH_STEPS grid steps (pipelining + v7x megacore), but
    # never shrink a block below ~_MIN_BLOCK_BYTES (per-step overhead).
    tile_for_steps = pl.cdiv(BC, _SMALL_PATH_STEPS)
    tile_floor = max(1, _MIN_BLOCK_BYTES // slab_bytes)
    bc_tile = min(bc_tile, max(tile_for_steps, tile_floor))

    grid = (pl.cdiv(BC, bc_tile),)  # ragged last block: reads padded, writes clipped

    # TODO(synk): when M < 128 the output block's last dim is lane-sparse and
    # every store is a masked vst.msk (<=M/128 lane occupancy) — on v6e/v7x the
    # store stream can then exceed HBM time. For such shapes, prefer fusing the
    # swap into the consumer (or pack along BC, e.g. bitcast 2xbf16->u32).
    return pl.pallas_call(
        _transpose_batched_kernel,
        out_shape=jax.ShapeDtypeStruct((BC, N, M), x3.dtype),
        grid_spec=pltpu.PrefetchScalarGridSpec(
            num_scalar_prefetch=0,
            grid=grid,
            # Last two block dims equal the full array dims -> always legal.
            in_specs=[pl.BlockSpec((bc_tile, M, N), lambda g: (g, 0, 0))],
            out_specs=pl.BlockSpec((bc_tile, N, M), lambda g: (g, 0, 0)),
        ),
        compiler_params=pltpu.CompilerParams(dimension_semantics=("parallel",)),
        cost_estimate=_cost(BC * M * N * x3.dtype.itemsize),
    )(x3)


def _transpose_large_trailing(x3):
    """x3: (BC, M, N) with a big M*N slab -> 1024x512 lane-dense tiles, no padding."""
    BC, M, N = x3.shape
    # Either a multiple of 128 (tile cap) or the full array dim -> always legal.
    tm = M if M <= _TILE_M else _TILE_M
    tn = N if N <= _TILE_N else _TILE_N
    grid = (BC, pl.cdiv(M, tm), pl.cdiv(N, tn))

    # Ragged edge blocks: out-of-bounds reads are undefined but the transpose
    # maps them exactly onto the clipped (unwritten) region of the output
    # block, so results are exact with zero pad/slice traffic.
    return pl.pallas_call(
        _transpose_tiled_kernel,
        out_shape=jax.ShapeDtypeStruct((BC, N, M), x3.dtype),
        grid_spec=pltpu.PrefetchScalarGridSpec(
            num_scalar_prefetch=0,
            grid=grid,
            in_specs=[
                pl.BlockSpec((pl.Squeezed(), tm, tn), lambda bc, i, j: (bc, i, j))
            ],
            out_specs=pl.BlockSpec(
                (pl.Squeezed(), tn, tm), lambda bc, i, j: (bc, j, i)
            ),
        ),
        compiler_params=pltpu.CompilerParams(
            dimension_semantics=("parallel", "parallel", "parallel")
        ),
        cost_estimate=_cost(BC * M * N * x3.dtype.itemsize),
    )(x3)


def transpose_last_pallas(x):
    """Swap the last two dims of an array [..., M, N] -> [..., N, M]."""
    if x.ndim < 2:
        raise ValueError("TransposeLast needs an input with at least 2 dims.")
    *lead, M, N = x.shape
    BC = math.prod(lead)
    if BC == 0 or M == 0 or N == 0:  # degenerate/empty: nothing to move
        return jnp.swapaxes(x, -2, -1)
    x3 = x.reshape(BC, M, N)
    slab_bytes = M * N * x.dtype.itemsize
    if slab_bytes <= _BLOCK_BYTE_BUDGET:
        out3 = _transpose_small_trailing(x3)
    else:
        out3 = _transpose_large_trailing(x3)
    return out3.reshape(*lead, N, M)


class TransposeLast:
    """JAX/Pallas port of the PyTorch TransposeLast module."""

    # TODO(synk): when this feeds a matmul/attention consumer, fuse the axis
    # swap into the consumer (dot_general dimension_numbers / swapped BlockSpec
    # index_map) instead of materializing a standalone transpose — on v7x the
    # XLU transpose can become the binding slot even when HBM is not.

    def __init__(self, deconstruct_idx=None):
        self.deconstruct_idx = deconstruct_idx

    def __call__(self, x):
        if self.deconstruct_idx is not None:
            # container / leading-axis indexing is glue, not kernel compute
            x = x[self.deconstruct_idx]
        return transpose_last_pallas(x)


if __name__ == "__main__":
    key = jax.random.PRNGKey(0)
    mod = TransposeLast()

    # Small-trailing-dim path (BC batching): [2, 4, 16, 32]
    B, C, M, N = 2, 4, 16, 32
    x = jax.random.normal(key, (B, C, M, N), dtype=jnp.float32)
    out = jax.block_until_ready(mod(x))
    ref = jnp.swapaxes(x, -2, -1)
    assert out.shape == (B, C, N, M)
    assert jnp.array_equal(out, ref)

    # deconstruct_idx path (tuple input, pick element 0)
    mod_idx = TransposeLast(deconstruct_idx=0)
    out2 = jax.block_until_ready(mod_idx((x, x * 2.0)))
    assert jnp.array_equal(out2, ref)

    # 3-D input (leading-dim flattening), bf16 dtype
    x3 = jax.random.normal(jax.random.PRNGKey(1), (3, 24, 40)).astype(jnp.bfloat16)
    out3 = jax.block_until_ready(mod(x3))
    assert jnp.array_equal(out3, jnp.swapaxes(x3, -2, -1))

    # Small path with a ragged BC grid (BC=7, bc_tile < BC, last block clipped)
    xr = jax.random.normal(jax.random.PRNGKey(3), (7, 300, 300), dtype=jnp.float32)
    outr = jax.block_until_ready(mod(xr))
    assert jnp.array_equal(outr, jnp.swapaxes(xr, -2, -1))

    # Large-trailing-dim path, N not a multiple of the tile (ragged j edge)
    xl = jax.random.normal(jax.random.PRNGKey(2), (2, 1024, 640), dtype=jnp.float32)
    outl = jax.block_until_ready(mod(xl))
    assert jnp.array_equal(outl, jnp.swapaxes(xl, -2, -1))

    # Large-trailing-dim path, ragged on BOTH tiled axes
    xq = jax.random.normal(jax.random.PRNGKey(4), (1, 1100, 1100), dtype=jnp.float32)
    outq = jax.block_until_ready(mod(xq))
    assert jnp.array_equal(outq, jnp.swapaxes(xq, -2, -1))

    print("KERNEL_OK")
</pallas_src>

<mosaic_0001>
module attributes {stable_mosaic.version = 11 : i64} {
  func.func @_transpose_batched_kernel(%arg0: i32, %arg1: memref<8x16x32xf32, #tpu.memory_space<vmem>>, %arg2: memref<8x32x16xf32, #tpu.memory_space<vmem>>) attributes {dimension_semantics = [#tpu.dimension_semantics<parallel>], iteration_bounds = array<i64: 1>, scalar_prefetch = 0 : i64, scratch_operands = 0 : i64, tpu.core_type = #tpu.core_type<tc>, window_params = [{transform_indices = @transform_0, window_bounds = array<i64: 8, 16, 32>}, {transform_indices = @transform_1, window_bounds = array<i64: 8, 32, 16>}]} {
    %c0 = arith.constant 0 : index
    %c0_0 = arith.constant 0 : index
    %c0_1 = arith.constant 0 : index
    %0 = vector.load %arg1[%c0, %c0_0, %c0_1] : memref<8x16x32xf32, #tpu.memory_space<vmem>>, vector<8x16x32xf32>
    %1 = tpu.transpose %0, [0, 2, 1] : vector<8x16x32xf32> -> vector<8x32x16xf32>
    %c0_2 = arith.constant 0 : index
    %c0_3 = arith.constant 0 : index
    %c0_4 = arith.constant 0 : index
    %2 = vector.load %arg2[%c0_2, %c0_3, %c0_4] : memref<8x32x16xf32, #tpu.memory_space<vmem>>, vector<8x32x16xf32>
    tpu.vector_store %arg2[%c0_2, %c0_3, %c0_4], %1 {strides = array<i32>} : memref<8x32x16xf32, #tpu.memory_space<vmem>>, vector<8x32x16xf32>,
    return
  }
  func.func @transform_0(%arg0: i32) -> (i32, i32, i32) {
    %c0_i32 = arith.constant 0 : i32
    %c0_i32_0 = arith.constant 0 : i32
    %c0_i32_1 = arith.constant 0 : i32
    return %arg0, %c0_i32, %c0_i32_0 : i32, i32, i32
  }
  func.func @transform_1(%arg0: i32) -> (i32, i32, i32) {
    %c0_i32 = arith.constant 0 : i32
    %c0_i32_0 = arith.constant 0 : i32
    %c0_i32_1 = arith.constant 0 : i32
    return %arg0, %c0_i32, %c0_i32_0 : i32, i32, i32
  }
}

</mosaic_0001>

<bundles_post_ra>
// kernel: tpu_custom_call.1
= control target key start
LH: loop header
LB: loop body
LE: loop exit
PB: predicated region body
PF: predicated region fallthrough
CT: control target
= control target key end

     0   :  { %6 = vsyncpa [#allocation3], 0  ;;  %s364_s9 = smov [#allocation2]   ;;  %s365_s11 = smov 128   ;;  %s508_s0 = inlined_call_operand.hbm [shape: f32[8,16,32], index: 0, kind: input, shape index: {}]   ;;  %s509_s1 = inlined_call_operand.vmem [shape: f32[8,32,16], index: 1, kind: output, shape index: {}]  }
   0x1   :  { %s11_s8 = sshll.u32 %s508_s0, 4  ;;  %s13_s10 = sshll.u32 %s364_s9, 4  ;;  %s12_s8 = int_to_ptr.hbm [resolvable:$true] %s11_s8  ;;  %s14_s10 = int_to_ptr.vmem [resolvable:$true] %s13_s10 }
   0x2   :  { %s366_s12 = smov 8  }
   0x3   :  { %19 = dma.hbm_to_vmem [thread:$0]  %s12_s8, 2048, %s14_s10, [#allocation3], %s365_s11, %s365_s11, %s366_s12  }
   0x4   :  { %362 = dma.done.wait [#allocation3], 2048  }
   0x5   :  { %363 = vsyncadd [#allocation3], 4294965248  ;;  %v26_v0 = vld [vmem:[#allocation2 + $0x10] sm:$0xff]  ;;  %v24_v1 = vld [vmem:[#allocation2] sm:$0xff]  ;;  %vm296_vm0 = vcmask 130048  }
   0x6   :  { %72 = vxpose.xlu1.b32.start [1/2] (short) (narrow) %v26_v0, 32  ;;  %40 = vxpose.xlu0.b32.start [1/2] (short) (narrow) %v24_v1, 32  ;;  %v27_v2 = vld [vmem:[#allocation2 + $0x18] sm:$0xff]  ;;  %v25_v3 = vld [vmem:[#allocation2 + $0x8] sm:$0xff]  ;;  %v28_v4 = vld [vmem:[#allocation2 + $0x20] sm:$0xff] }
   0x7   :  { %104 = vxpose.xlu2.b32.start [1/2] (short) (narrow) %v28_v4, 32  ;;  %v29_v5 = vld [vmem:[#allocation2 + $0x28] sm:$0xff]  ;;  %v32_v6 = vld [vmem:[#allocation2 + $0x40] sm:$0xff]  ;;  %v30_v7 = vld [vmem:[#allocation2 + $0x30] sm:$0xff] }
   0x8   :  { %v33_v8 = vld [vmem:[#allocation2 + $0x48] sm:$0xff]  ;;  %v31_v9 = vld [vmem:[#allocation2 + $0x38] sm:$0xff]  ;;  %v34_v10 = vld [vmem:[#allocation2 + $0x50] sm:$0xff] }
   0x9   :  { %v35_v11 = vld [vmem:[#allocation2 + $0x58] sm:$0xff]  ;;  %v38_v12 = vld [vmem:[#allocation2 + $0x70] sm:$0xff]  ;;  %v36_v13 = vld [vmem:[#allocation2 + $0x60] sm:$0xff] }
   0xa   :  { %v39_v14 = vld [vmem:[#allocation2 + $0x78] sm:$0xff]  ;;  %v37_v15 = vld [vmem:[#allocation2 + $0x68] sm:$0xff] }
   0xe   :  { %73 = vxpose.xlu1.b32.end [2/2] (short) (narrow) %v27_v2, 32  ;;  %41 = vxpose.xlu0.b32.end [2/2] (short) (narrow) %v25_v3, 32 }
   0xf   :  { %105 = vxpose.xlu2.b32.end [2/2] (short) (narrow) %v29_v5, 32 }
  0x26   :  { %168 = vxpose.xlu1.b32.start [1/2] (short) (narrow) %v32_v6, 32  ;;  %136 = vxpose.xlu0.b32.start [1/2] (short) (narrow) %v30_v7, 32 }
  0x27   :  { %200 = vxpose.xlu2.b32.start [1/2] (short) (narrow) %v34_v10, 32 }
  0x2e   :  { %169 = vxpose.xlu1.b32.end [2/2] (short) (narrow) %v33_v8, 32  ;;  %137 = vxpose.xlu0.b32.end [2/2] (short) (narrow) %v31_v9, 32 }
  0x2f   :  { %201 = vxpose.xlu2.b32.end [2/2] (short) (narrow) %v35_v11, 32 }
  0x46   :  { %264 = vxpose.xlu1.b32.start [1/2] (short) (narrow) %v38_v12, 32  ;;  %232 = vxpose.xlu0.b32.start [1/2] (short) (narrow) %v36_v13, 32 }
  0x4e   :  { %265 = vxpose.xlu1.b32.end [2/2] (short) (narrow) %v39_v14, 32  ;;  %233 = vxpose.xlu0.b32.end [2/2] (short) (narrow) %v37_v15, 32 }
  0xa0   :  { %v120_v16 = vpop.trf.xlu2 }
  0xa1   :  { %305 = vst.msk [vmem:[%s509_s1 + $0x40] sm:$0xff] %vm296_vm0, %v120_v16 }
  0xa8   :  { %v121_v19 = vpop.trf.xlu2 }
  0xa9   :  { %306 = vst.msk [vmem:[%s509_s1 + $0x48] sm:$0xff] %vm296_vm0, %v121_v19 }
  0xaa   :  { %v88_v17 = vpop.trf.xlu1  ;;  %v56_v18 = vpop.trf.xlu0 }
  0xab   :  { %301 = vst.msk [vmem:[%s509_s1 + $0x20] sm:$0xff] %vm296_vm0, %v88_v17 }
  0xac   :  { %297 = vst.msk [vmem:[%s509_s1] sm:$0xff] %vm296_vm0, %v56_v18 }
  0xb0   :  { %v122_v22 = vpop.trf.xlu2 }
  0xb1   :  { %307 = vst.msk [vmem:[%s509_s1 + $0x50] sm:$0xff] %vm296_vm0, %v122_v22 }
  0xb2   :  { %v89_v20 = vpop.trf.xlu1  ;;  %v57_v21 = vpop.trf.xlu0 }
  0xb3   :  { %302 = vst.msk [vmem:[%s509_s1 + $0x28] sm:$0xff] %vm296_vm0, %v89_v20 }
  0xb4   :  { %298 = vst.msk [vmem:[%s509_s1 + $0x8] sm:$0xff] %vm296_vm0, %v57_v21 }
  0xb8   :  { %v123_v25 = vpop.trf.xlu2 }
  0xb9   :  { %308 = vst.msk [vmem:[%s509_s1 + $0x58] sm:$0xff] %vm296_vm0, %v123_v25 }
  0xba   :  { %v90_v23 = vpop.trf.xlu1  ;;  %v58_v24 = vpop.trf.xlu0 }
  0xbb   :  { %303 = vst.msk [vmem:[%s509_s1 + $0x30] sm:$0xff] %vm296_vm0, %v90_v23 }
  0xbc   :  { %299 = vst.msk [vmem:[%s509_s1 + $0x10] sm:$0xff] %vm296_vm0, %v58_v24 }
  0xc0   :  { %v216_v28 = vpop.trf.xlu2 }
  0xc1   :  { %317 = vst.msk [vmem:[%s509_s1 + $0xa0] sm:$0xff] %vm296_vm0, %v216_v28 }
  0xc2   :  { %v91_v26 = vpop.trf.xlu1  ;;  %v59_v27 = vpop.trf.xlu0 }
  0xc3   :  { %304 = vst.msk [vmem:[%s509_s1 + $0x38] sm:$0xff] %vm296_vm0, %v91_v26 }
  0xc4   :  { %300 = vst.msk [vmem:[%s509_s1 + $0x18] sm:$0xff] %vm296_vm0, %v59_v27 }
  0xc8   :  { %v217_v31 = vpop.trf.xlu2 }
  0xc9   :  { %318 = vst.msk [vmem:[%s509_s1 + $0xa8] sm:$0xff] %vm296_vm0, %v217_v31 }
  0xca   :  { %v184_v29 = vpop.trf.xlu1  ;;  %v152_v30 = vpop.trf.xlu0 }
  0xcb   :  { %313 = vst.msk [vmem:[%s509_s1 + $0x80] sm:$0xff] %vm296_vm0, %v184_v29 }
  0xcc   :  { %309 = vst.msk [vmem:[%s509_s1 + $0x60] sm:$0xff] %vm296_vm0, %v152_v30 }
  0xd0   :  { %v218_v34 = vpop.trf.xlu2 }
  0xd1   :  { %319 = vst.msk [vmem:[%s509_s1 + $0xb0] sm:$0xff] %vm296_vm0, %v218_v34 }
  0xd2   :  { %v185_v32 = vpop.trf.xlu1  ;;  %v153_v33 = vpop.trf.xlu0 }
  0xd3   :  { %314 = vst.msk [vmem:[%s509_s1 + $0x88] sm:$0xff] %vm296_vm0, %v185_v32 }
  0xd4   :  { %310 = vst.msk [vmem:[%s509_s1 + $0x68] sm:$0xff] %vm296_vm0, %v153_v33 }
  0xd8   :  { %v219_v37 = vpop.trf.xlu2 }
  0xd9   :  { %320 = vst.msk [vmem:[%s509_s1 + $0xb8] sm:$0xff] %vm296_vm0, %v219_v37 }
  0xda   :  { %v186_v35 = vpop.trf.xlu1  ;;  %v154_v36 = vpop.trf.xlu0 }
  0xdb   :  { %315 = vst.msk [vmem:[%s509_s1 + $0x90] sm:$0xff] %vm296_vm0, %v186_v35 }
  0xdc   :  { %311 = vst.msk [vmem:[%s509_s1 + $0x70] sm:$0xff] %vm296_vm0, %v154_v36 }
  0xe2   :  { %v187_v38 = vpop.trf.xlu1  ;;  %v155_v39 = vpop.trf.xlu0 }
  0xe3   :  { %316 = vst.msk [vmem:[%s509_s1 + $0x98] sm:$0xff] %vm296_vm0, %v187_v38 }
  0xe4   :  { %312 = vst.msk [vmem:[%s509_s1 + $0x78] sm:$0xff] %vm296_vm0, %v155_v39 }
  0xea   :  { %v280_v40 = vpop.trf.xlu1  ;;  %v248_v41 = vpop.trf.xlu0 }
  0xeb   :  { %325 = vst.msk [vmem:[%s509_s1 + $0xe0] sm:$0xff] %vm296_vm0, %v280_v40 }
  0xec   :  { %321 = vst.msk [vmem:[%s509_s1 + $0xc0] sm:$0xff] %vm296_vm0, %v248_v41 }
  0xf2   :  { %v281_v42 = vpop.trf.xlu1  ;;  %v249_v43 = vpop.trf.xlu0 }
  0xf3   :  { %326 = vst.msk [vmem:[%s509_s1 + $0xe8] sm:$0xff] %vm296_vm0, %v281_v42 }
  0xf4   :  { %322 = vst.msk [vmem:[%s509_s1 + $0xc8] sm:$0xff] %vm296_vm0, %v249_v43 }
  0xfa   :  { %v282_v44 = vpop.trf.xlu1  ;;  %v250_v45 = vpop.trf.xlu0 }
  0xfb   :  { %327 = vst.msk [vmem:[%s509_s1 + $0xf0] sm:$0xff] %vm296_vm0, %v282_v44 }
  0xfc   :  { %323 = vst.msk [vmem:[%s509_s1 + $0xd0] sm:$0xff] %vm296_vm0, %v250_v45 }
 0x102   :  { %v283_v46 = vpop.trf.xlu1  ;;  %v251_v47 = vpop.trf.xlu0 }
 0x103   :  { %328 = vst.msk [vmem:[%s509_s1 + $0xf8] sm:$0xff] %vm296_vm0, %v283_v46 }
 0x104   :  { %324 = vst.msk [vmem:[%s509_s1 + $0xd8] sm:$0xff] %vm296_vm0, %v251_v47 }
 0x105   :  { %333 = vsyncpa [#allocation3], 1 }

</bundles_post_ra>
